<compile_context>
chip_gen: v7x
topology: tpu7x:2x2x1
jax: 0.10.0
libtpu: 0.0.40
codegen_flags: <defaults>
</compile_context>

<pallas_src>
import jax
import jax.numpy as jnp
from jax.experimental import pallas as pl
from jax.experimental.pallas import tpu as pltpu

HIDDEN = 256


def _round_up(x, m):
    return ((x + m - 1) // m) * m


def _cdiv(a, b):
    return -(-a // b)


def _vmem_limit_bytes():
    """Generation-aware scoped-VMEM cap: 64 MiB on 128-MiB parts (v5e/v6e), 32 MiB on
    64-MiB parts (v7x). Conservative 32 MiB fallback if the query is unavailable."""
    try:
        cap = int(pltpu.get_tpu_info().vmem_capacity_bytes)
        return int(min(64 * 1024 * 1024, cap // 2))
    except Exception:
        return 32 * 1024 * 1024


def _choose_batch_tile(B, block_b=1024):
    """Batch tile: multiple of 128 (MXU / bf16 layout friendly), >= 2 grid steps once the
    batch is big enough (v7x megacore), minimal padded rows, capped at block_b."""
    block_b = max(128, _round_up(block_b, 128))
    b128 = _round_up(B, 128)
    if b128 < 512:
        # Splitting tiny batches is pure per-step overhead (~0.35 us/step).
        return b128
    n_tiles = max(2, _cdiv(B, block_b))
    return min(block_b, _round_up(_cdiv(B, n_tiles), 128))


def critic_kernel(x_ref, w1_ref, b1_ref, w2_ref, b2_ref, w3_ref, b3_ref, out_ref):
    # Layer 1: relu(x @ W1 + b1) — single dot over the fused concat, f32 accumulate.
    h1 = jnp.dot(x_ref[...], w1_ref[...], preferred_element_type=jnp.float32)
    h1 = jnp.maximum(h1 + b1_ref[...], 0.0)
    # Layer 2: relu(h1 @ W2 + b2) — bf16 operands, f32 accumulate, f32 elementwise.
    h2 = jnp.dot(h1.astype(jnp.bfloat16), w2_ref[...], preferred_element_type=jnp.float32)
    h2 = jnp.maximum(h2 + b2_ref[...], 0.0)
    # Output quantiles (lane-dense, padded to 128 columns), stored bf16.
    out = jnp.dot(h2.astype(jnp.bfloat16), w3_ref[...], preferred_element_type=jnp.float32)
    out_ref[...] = (out + b3_ref[...]).astype(out_ref.dtype)


def critic_forward(s, a, params, n_quantiles, *, block_b=1024, trim=True):
    """Pallas forward pass of Critic.

    s: [B, obs_dim] f32, a: [B, act_dim] f32 -> [B, n_quantiles] bf16 (trim=True)
    or the padded [bp, nq_pad] bf16 slab (trim=False, lets the consumer fuse the slice).
    """
    w1, b1, w2, b2, w3p, b3p = params
    B = s.shape[0]
    in_dim = w1.shape[0]
    nq_pad = w3p.shape[1]
    assert s.shape[1] + a.shape[1] == in_dim

    # Fuse concat + f32->bf16 cast into one XLA op; the kernel then needs a single
    # layer-1 dot with K = obs_dim + act_dim.
    x = jnp.concatenate([s, a], axis=-1).astype(jnp.bfloat16)

    tb = _choose_batch_tile(B, block_b)
    bp = _round_up(B, tb)
    if bp != B:
        x = jnp.pad(x, ((0, bp - B), (0, 0)))
    grid = (bp // tb,)

    # Weights/biases: constant block index -> fetched once, VMEM-resident across the grid.
    def resident(shape):
        return pl.BlockSpec(shape, lambda i: (0,) * len(shape))

    flops = 2 * bp * (in_dim * HIDDEN + HIDDEN * HIDDEN + HIDDEN * nq_pad)
    bytes_accessed = (
        x.size * 2                                             # bf16 activations in
        + (w1.size + w2.size + w3p.size) * 2                   # bf16 weights (resident)
        + (b1.size + b2.size + b3p.size) * 4                   # f32 biases
        + bp * nq_pad * 2                                      # bf16 output
    )

    out_padded = pl.pallas_call(
        critic_kernel,
        out_shape=jax.ShapeDtypeStruct((bp, nq_pad), jnp.bfloat16),
        grid=grid,
        in_specs=[
            pl.BlockSpec((tb, in_dim), lambda i: (i, 0)),
            resident(w1.shape), resident(b1.shape),
            resident(w2.shape), resident(b2.shape),
            resident(w3p.shape), resident(b3p.shape),
        ],
        out_specs=pl.BlockSpec((tb, nq_pad), lambda i: (i, 0)),
        compiler_params=pltpu.CompilerParams(
            dimension_semantics=("parallel",),
            vmem_limit_bytes=_vmem_limit_bytes(),
        ),
        cost_estimate=pl.CostEstimate(
            flops=flops, transcendentals=0, bytes_accessed=bytes_accessed),
    )(x, w1, b1, w2, b2, w3p, b3p)

    if trim:
        return out_padded[:B, :n_quantiles]
    return out_padded


def init_critic_params(key, obs_dim, act_dim, n_quantiles, hidden=HIDDEN):
    """PyTorch-nn.Linear-style init (U[-1/sqrt(fan_in), 1/sqrt(fan_in)]).

    Kernel layout: single W1 of shape (obs_dim+act_dim, hidden) (concat fused in the
    wrapper), W3/b3 zero-padded to 128 output lanes, weights bf16, biases f32.
    """
    in_dim = obs_dim + act_dim
    _, k1w, k1b, k2w, k2b, k3w, k3b = jax.random.split(key, 7)

    def uni(k, shape, fan_in):
        bound = 1.0 / jnp.sqrt(jnp.float32(fan_in))
        return jax.random.uniform(k, shape, jnp.float32, -bound, bound)

    w1 = uni(k1w, (in_dim, hidden), in_dim)
    b1 = uni(k1b, (1, hidden), in_dim)
    w2 = uni(k2w, (hidden, hidden), hidden)
    b2 = uni(k2b, (1, hidden), hidden)
    w3 = uni(k3w, (hidden, n_quantiles), hidden)
    b3 = uni(k3b, (1, n_quantiles), hidden)

    # Zero-pad the quantile dim to a lane-dense width (multiple of 128).
    nq_pad = _round_up(n_quantiles, 128)
    w3p = jnp.zeros((hidden, nq_pad), jnp.float32).at[:, :n_quantiles].set(w3)
    b3p = jnp.zeros((1, nq_pad), jnp.float32).at[:, :n_quantiles].set(b3)

    return (w1.astype(jnp.bfloat16), b1,
            w2.astype(jnp.bfloat16), b2,
            w3p.astype(jnp.bfloat16), b3p)


def critic_ref(s, a, params, n_quantiles):
    """Pure-JAX f32 reference (same weight values, original module semantics)."""
    w1, b1, w2, b2, w3p, b3p = [p.astype(jnp.float32) for p in params]
    x = jnp.concatenate([s, a], axis=-1).astype(jnp.float32)
    h1 = jnp.maximum(x @ w1 + b1, 0.0)
    h2 = jnp.maximum(h1 @ w2 + b2, 0.0)
    return (h2 @ w3p + b3p)[:, :n_quantiles]


if __name__ == "__main__":
    obs_dim, act_dim, n_quantiles = 17, 6, 25

    key = jax.random.PRNGKey(0)
    kp, ks, ka = jax.random.split(key, 3)
    params = init_critic_params(kp, obs_dim, act_dim, n_quantiles)

    fwd = jax.jit(critic_forward, static_argnames=("n_quantiles", "block_b", "trim"))

    # Small batch (latency path, single 128-row tile).
    s = jax.random.normal(ks, (8, obs_dim), jnp.float32)
    a = jax.random.normal(ka, (8, act_dim), jnp.float32)
    out = jax.block_until_ready(fwd(s, a, params, n_quantiles=n_quantiles))
    ref = critic_ref(s, a, params, n_quantiles)
    assert out.shape == (8, n_quantiles)
    assert jnp.allclose(out.astype(jnp.float32), ref, atol=3e-2, rtol=3e-2), "mismatch (B=8)"

    # Moderate batch: exercises the multi-tile grid (2 parallel 384-row steps).
    s2 = jax.random.normal(ks, (600, obs_dim), jnp.float32)
    a2 = jax.random.normal(ka, (600, act_dim), jnp.float32)
    out2 = jax.block_until_ready(fwd(s2, a2, params, n_quantiles=n_quantiles))
    ref2 = critic_ref(s2, a2, params, n_quantiles)
    assert out2.shape == (600, n_quantiles)
    assert jnp.allclose(out2.astype(jnp.float32), ref2, atol=3e-2, rtol=3e-2), "mismatch (B=600)"

    print("KERNEL_OK")
</pallas_src>

<mosaic_0001>
module attributes {stable_mosaic.version = 11 : i64} {
  func.func @critic_kernel(%arg0: i32, %arg1: memref<128x23xbf16, #tpu.memory_space<vmem>>, %arg2: memref<23x256xbf16, #tpu.memory_space<vmem>>, %arg3: memref<1x256xf32, #tpu.memory_space<vmem>>, %arg4: memref<256x256xbf16, #tpu.memory_space<vmem>>, %arg5: memref<1x256xf32, #tpu.memory_space<vmem>>, %arg6: memref<256x128xbf16, #tpu.memory_space<vmem>>, %arg7: memref<1x128xf32, #tpu.memory_space<vmem>>, %arg8: memref<128x128xbf16, #tpu.memory_space<vmem>>) attributes {dimension_semantics = [#tpu.dimension_semantics<parallel>], iteration_bounds = array<i64: 1>, scalar_prefetch = 0 : i64, scratch_operands = 0 : i64, tpu.core_type = #tpu.core_type<tc>, window_params = [{transform_indices = @transform_0, window_bounds = array<i64: 128, 23>}, {pipeline_mode = #tpu.pipeline_mode<synchronous>, transform_indices = @transform_1, window_bounds = array<i64: 23, 256>}, {pipeline_mode = #tpu.pipeline_mode<synchronous>, transform_indices = @transform_2, window_bounds = array<i64: 1, 256>}, {pipeline_mode = #tpu.pipeline_mode<synchronous>, transform_indices = @transform_3, window_bounds = array<i64: 256, 256>}, {pipeline_mode = #tpu.pipeline_mode<synchronous>, transform_indices = @transform_4, window_bounds = array<i64: 1, 256>}, {pipeline_mode = #tpu.pipeline_mode<synchronous>, transform_indices = @transform_5, window_bounds = array<i64: 256, 128>}, {pipeline_mode = #tpu.pipeline_mode<synchronous>, transform_indices = @transform_6, window_bounds = array<i64: 1, 128>}, {transform_indices = @transform_7, window_bounds = array<i64: 128, 128>}]} {
    %c0 = arith.constant 0 : index
    %c0_0 = arith.constant 0 : index
    %0 = vector.load %arg1[%c0, %c0_0] : memref<128x23xbf16, #tpu.memory_space<vmem>>, vector<128x23xbf16>
    %c0_1 = arith.constant 0 : index
    %c0_2 = arith.constant 0 : index
    %1 = vector.load %arg2[%c0_1, %c0_2] : memref<23x256xbf16, #tpu.memory_space<vmem>>, vector<23x256xbf16>
    %cst = arith.constant dense<0.000000e+00> : vector<128x256xf32>
    %2 = tpu.matmul %0, %1, %cst {dimension_numbers = #tpu.dot_dimension_numbers<[1], [0], [0], [1], [0, 0, 1, 1], [], []>} : vector<128x23xbf16>, vector<23x256xbf16>, vector<128x256xf32> -> vector<128x256xf32>
    %c0_3 = arith.constant 0 : index
    %c0_4 = arith.constant 0 : index
    %3 = vector.load %arg3[%c0_3, %c0_4] : memref<1x256xf32, #tpu.memory_space<vmem>>, vector<1x256xf32>
    %4 = vector.broadcast %3 : vector<1x256xf32> to vector<128x256xf32>
    %5 = arith.addf %2, %4 : vector<128x256xf32>
    %cst_5 = arith.constant 0.000000e+00 : f32
    %6 = vector.broadcast %cst_5 : f32 to vector<128x256xf32>
    %7 = arith.maximumf %5, %6 : vector<128x256xf32>
    %8 = arith.truncf %7 : vector<128x256xf32> to vector<128x256xbf16>
    %c0_6 = arith.constant 0 : index
    %c0_7 = arith.constant 0 : index
    %9 = vector.load %arg4[%c0_6, %c0_7] : memref<256x256xbf16, #tpu.memory_space<vmem>>, vector<256x256xbf16>
    %cst_8 = arith.constant dense<0.000000e+00> : vector<128x256xf32>
    %10 = tpu.matmul %8, %9, %cst_8 {dimension_numbers = #tpu.dot_dimension_numbers<[1], [0], [0], [1], [0, 0, 1, 1], [], []>} : vector<128x256xbf16>, vector<256x256xbf16>, vector<128x256xf32> -> vector<128x256xf32>
    %c0_9 = arith.constant 0 : index
    %c0_10 = arith.constant 0 : index
    %11 = vector.load %arg5[%c0_9, %c0_10] : memref<1x256xf32, #tpu.memory_space<vmem>>, vector<1x256xf32>
    %12 = vector.broadcast %11 : vector<1x256xf32> to vector<128x256xf32>
    %13 = arith.addf %10, %12 : vector<128x256xf32>
    %cst_11 = arith.constant 0.000000e+00 : f32
    %14 = vector.broadcast %cst_11 : f32 to vector<128x256xf32>
    %15 = arith.maximumf %13, %14 : vector<128x256xf32>
    %16 = arith.truncf %15 : vector<128x256xf32> to vector<128x256xbf16>
    %c0_12 = arith.constant 0 : index
    %c0_13 = arith.constant 0 : index
    %17 = vector.load %arg6[%c0_12, %c0_13] : memref<256x128xbf16, #tpu.memory_space<vmem>>, vector<256x128xbf16>
    %cst_14 = arith.constant dense<0.000000e+00> : vector<128x128xf32>
    %18 = tpu.matmul %16, %17, %cst_14 {dimension_numbers = #tpu.dot_dimension_numbers<[1], [0], [0], [1], [0, 0, 1, 1], [], []>} : vector<128x256xbf16>, vector<256x128xbf16>, vector<128x128xf32> -> vector<128x128xf32>
    %c0_15 = arith.constant 0 : index
    %c0_16 = arith.constant 0 : index
    %19 = vector.load %arg7[%c0_15, %c0_16] : memref<1x128xf32, #tpu.memory_space<vmem>>, vector<1x128xf32>
    %20 = vector.broadcast %19 : vector<1x128xf32> to vector<128x128xf32>
    %21 = arith.addf %18, %20 : vector<128x128xf32>
    %22 = arith.truncf %21 : vector<128x128xf32> to vector<128x128xbf16>
    %c0_17 = arith.constant 0 : index
    %c0_18 = arith.constant 0 : index
    %23 = vector.load %arg8[%c0_17, %c0_18] : memref<128x128xbf16, #tpu.memory_space<vmem>>, vector<128x128xbf16>
    tpu.vector_store %arg8[%c0_17, %c0_18], %22 {strides = array<i32>} : memref<128x128xbf16, #tpu.memory_space<vmem>>, vector<128x128xbf16>,
    return
  }
  func.func @transform_0(%arg0: i32) -> (i32, i32) {
    %c0_i32 = arith.constant 0 : i32
    %c0_i32_0 = arith.constant 0 : i32
    return %arg0, %c0_i32 : i32, i32
  }
  func.func @transform_1(%arg0: i32) -> (i32, i32) {
    %c0_i32 = arith.constant 0 : i32
    %c0_i32_0 = arith.constant 0 : i32
    %c0_i32_1 = arith.constant 0 : i32
    return %c0_i32, %c0_i32_0 : i32, i32
  }
  func.func @transform_2(%arg0: i32) -> (i32, i32) {
    %c0_i32 = arith.constant 0 : i32
    %c0_i32_0 = arith.constant 0 : i32
    %c0_i32_1 = arith.constant 0 : i32
    return %c0_i32, %c0_i32_0 : i32, i32
  }
  func.func @transform_3(%arg0: i32) -> (i32, i32) {
    %c0_i32 = arith.constant 0 : i32
    %c0_i32_0 = arith.constant 0 : i32
    %c0_i32_1 = arith.constant 0 : i32
    return %c0_i32, %c0_i32_0 : i32, i32
  }
  func.func @transform_4(%arg0: i32) -> (i32, i32) {
    %c0_i32 = arith.constant 0 : i32
    %c0_i32_0 = arith.constant 0 : i32
    %c0_i32_1 = arith.constant 0 : i32
    return %c0_i32, %c0_i32_0 : i32, i32
  }
  func.func @transform_5(%arg0: i32) -> (i32, i32) {
    %c0_i32 = arith.constant 0 : i32
    %c0_i32_0 = arith.constant 0 : i32
    %c0_i32_1 = arith.constant 0 : i32
    return %c0_i32, %c0_i32_0 : i32, i32
  }
  func.func @transform_6(%arg0: i32) -> (i32, i32) {
    %c0_i32 = arith.constant 0 : i32
    %c0_i32_0 = arith.constant 0 : i32
    %c0_i32_1 = arith.constant 0 : i32
    return %c0_i32, %c0_i32_0 : i32, i32
  }
  func.func @transform_7(%arg0: i32) -> (i32, i32) {
    %c0_i32 = arith.constant 0 : i32
    %c0_i32_0 = arith.constant 0 : i32
    return %arg0, %c0_i32 : i32, i32
  }
}

</mosaic_0001>

<bundles_post_ra>
// kernel: critic_forward.1
= control target key start
LH: loop header
LB: loop body
LE: loop exit
PB: predicated region body
PF: predicated region fallthrough
CT: control target
= control target key end

     0   :  { %12 = vsyncpa [#allocation3], 0  ;;  %s1621_s0 = inlined_call_operand.vmem [shape: bf16[128,23], index: 0, kind: input, shape index: {}]   ;;  %s1622_s1 = inlined_call_operand.vmem [shape: bf16[23,256], index: 1, kind: input, shape index: {}]   ;;  %s1623_s2 = inlined_call_operand.vmem [shape: f32[1,256], index: 2, kind: input, shape index: {}]   ;;  %s1624_s3 = inlined_call_operand.hbm [shape: bf16[256,256], index: 3, kind: input, shape index: {}]   ;;  %s1625_s4 = inlined_call_operand.vmem [shape: f32[1,256], index: 4, kind: input, shape index: {}]   ;;  %s1626_s5 = inlined_call_operand.hbm [shape: bf16[256,128], index: 5, kind: input, shape index: {}]   ;;  %s1627_s6 = inlined_call_operand.vmem [shape: f32[1,128], index: 6, kind: input, shape index: {}]   ;;  %s1628_s7 = inlined_call_operand.vmem [shape: bf16[128,128], index: 7, kind: output, shape index: {}]  }
   0x1   :  { %13 = vsyncpa [#allocation5], 0  ;;  %s1365_s24 = smov [#allocation2]   ;;  %s1317_s28 = scalar_lea.hbm %s1624_s3, 4096 }
   0x2   :  { %s25_s25 = sshll.u32 %s1365_s24, 4  ;;  %p1318_p0 = scmp.ne.s32.totalorder %s1624_s3, %s1317_s28  ;;  %s26_s25 = int_to_ptr.vmem [resolvable:$true] %s25_s25 }
   0x3   :  { %p1321_p1 = scmp.lt.u32.totalorder %s1317_s28, %s1624_s3 }
   0x5   :  { %p1323_p2 = pnand %p1321_p1, %p1318_p0 }
   0x7   :  { %1326 = shalt.err (!%p1323_p2)
}
   0x8   :  { %s1327_s10 = scalar_lea.vmem %s26_s25, 4096  ;;  %p1332_p4 = scmp.lt.s32.totalorder %s26_s25, %s26_s25 }
   0x9   :  { %p1328_p3 = scmp.ne.s32.totalorder %s26_s25, %s1327_s10  ;;  %p1333_p5 = scmp.lt.s32.totalorder %s1327_s10, %s1327_s10 }
   0xb   :  { %p1334_p6 = por %p1333_p5, %p1332_p4 }
   0xd   :  { %p1335_p7 = pnand %p1334_p6, %p1328_p3 }
   0xf   :  { %1338 = shalt.err (!%p1335_p7)
}
  0x10   :  { %s1366_s11 = smov 128   ;;  %s1367_s12 = smov 8  }
  0x11   :  { %31 = dma.hbm_to_vmem [thread:$0]  %s1624_s3, 4096, %s26_s25, [#allocation3], %s1366_s11, %s1366_s11, %s1367_s12  }
  0x12   :  { %s1368_s15 = smov [#allocation4]   ;;  %s1339_s19 = scalar_lea.hbm %s1626_s5, 2048 }
  0x13   :  { %s39_s16 = sshll.u32 %s1368_s15, 4  ;;  %p1340_p8 = scmp.ne.s32.totalorder %s1626_s5, %s1339_s19  ;;  %s40_s16 = int_to_ptr.vmem [resolvable:$true] %s39_s16 }
  0x14   :  { %p1343_p9 = scmp.lt.u32.totalorder %s1339_s19, %s1626_s5 }
  0x16   :  { %p1345_p10 = pnand %p1343_p9, %p1340_p8 }
  0x18   :  { %1348 = shalt.err (!%p1345_p10)
}
  0x19   :  { %s1349_s24 = scalar_lea.vmem %s40_s16, 2048  ;;  %p1354_p12 = scmp.lt.s32.totalorder %s40_s16, %s40_s16 }
  0x1a   :  { %p1350_p11 = scmp.ne.s32.totalorder %s40_s16, %s1349_s24  ;;  %p1355_p13 = scmp.lt.s32.totalorder %s1349_s24, %s1349_s24 }
  0x1c   :  { %p1356_p0 = por %p1355_p13, %p1354_p12 }
  0x1e   :  { %p1357_p1 = pnand %p1356_p0, %p1350_p11 }
  0x20   :  { %1360 = shalt.err (!%p1357_p1)
}
  0x21   :  { %s1369_s3 = smov 64   ;;  %s1370_s25 = smov 4  }
  0x22   :  { %45 = dma.hbm_to_vmem [thread:$0]  %s1626_s5, 2048, %s40_s16, [#allocation5], %s1369_s3, %s1369_s3, %s1370_s25  }
  0x23   :  { %1361 = dma.done.wait [#allocation3], 4096  }
  0x24   :  { %1362 = vsyncadd [#allocation3], 4294963200 }
  0x25   :  { %1363 = dma.done.wait [#allocation5], 2048  }
  0x26   :  { %1364 = vsyncadd [#allocation5], 4294965248  ;;  %v1371_v0 = vmov 0   ;;  %vm166_vm0 = vcmask 1042432   ;;  %vm167_vm1 = vcmask 1043456   ;;  %v1372_v1 = vmov 65535  }
  0x27   :  { %208 = vmatprep.mubr.bf16.mxu0 %v1371_v0  ;;  %v168_v2 = vsel %vm166_vm0, 4294967295, %v1372_v1  ;;  %v1240_v3 = vld [vmem:[%s1622_s1 + $0x4] ss:$8 sps:$4 sm:$0xff]   ;;  %v1242_v4 = vld [vmem:[%s1622_s1] ss:$8 sps:$4 sm:$0xff]   ;;  %v73_v5 = vld [vmem:[%s1622_s1 + $0x10] sm:$0xff]  ;;  %v76_v1 = vlaneseq }
  0x28   :  { %v169_v6 = vsel %vm167_vm1, %v168_v2, 0  ;;  %176 = vmatprep.subr.bf16.mxu0 %v1240_v3  ;;  %v1031_v7 = vcombine.high %v73_v5, %v73_v5  ;;  %v1030_v8 = vcombine.low %v73_v5, %v73_v5  ;;  %v1245_v11 = vld [vmem:[%s1621_s0] sm:$0xff]   ;;  %vm141_vm2 = vcmask 187392   ;;  %v1256_v14 = vld [vmem:[#allocation2 + $0x14] ss:$8 sps:$4 sm:$0xff]   ;;  %v1246_v16 = vld [vmem:[%s1621_s0 + $0x8] sm:$0xff]  }
  0x29   :  { %177 = vmatpush1.bf16.msra.mxu0 %v1242_v4  ;;  %v1253_v12 = vld [vmem:[#allocation2 + $0x4] ss:$8 sps:$4 sm:$0xff]   ;;  %v1255_v13 = vld [vmem:[#allocation2] ss:$8 sps:$4 sm:$0xff]   ;;  %v1258_v15 = vld [vmem:[#allocation2 + $0x10] ss:$8 sps:$4 sm:$0xff]  }
  0x2a   :  { %v174_v9 = vand.u32 %v1031_v7, %v169_v6  ;;  %v171_v10 = vand.u32 %v1030_v8, %v169_v6  ;;  %541 = vmatprep.subr.bf16.mxu1 %v1253_v12  ;;  %v1259_v17 = vld [vmem:[#allocation2 + $0x24] ss:$8 sps:$4 sm:$0xff]   ;;  %v1261_v18 = vld [vmem:[#allocation2 + $0x20] ss:$8 sps:$4 sm:$0xff]   ;;  %v1262_v19 = vld [vmem:[#allocation2 + $0x34] ss:$8 sps:$4 sm:$0xff]  }
  0x2b   :  { %542 = vmatpush1.bf16.msra.mxu1 %v1255_v13  ;;  %v1264_v20 = vld [vmem:[#allocation2 + $0x30] ss:$8 sps:$4 sm:$0xff]   ;;  %v1265_v22 = vld [vmem:[#allocation2 + $0x44] ss:$8 sps:$4 sm:$0xff]   ;;  %v1267_v23 = vld [vmem:[#allocation2 + $0x40] ss:$8 sps:$4 sm:$0xff]  }
  0x2c   :  { %178 = vmatprep.subr.bf16.mxu0 %v174_v9  ;;  %543 = vmatprep.subr.bf16.mxu1 %v1256_v14  ;;  %v1247_v21 = vld [vmem:[%s1621_s0 + $0x10] sm:$0xff]   ;;  %v1248_v26 = vld [vmem:[%s1621_s0 + $0x18] sm:$0xff]   ;;  %v1271_v27 = vld [vmem:[#allocation2 + $0x64] ss:$8 sps:$4 sm:$0xff]   ;;  %v1486_v2 = vshrl.u32 %v76_v1, 7 }
  0x2d   :  { %179 = vmatpush1.bf16.msra.mxu0 %v171_v10  ;;  %v1268_v24 = vld [vmem:[#allocation2 + $0x54] ss:$8 sps:$4 sm:$0xff]   ;;  %v1270_v25 = vld [vmem:[#allocation2 + $0x50] ss:$8 sps:$4 sm:$0xff]   ;;  %v1273_v28 = vld [vmem:[#allocation2 + $0x60] ss:$8 sps:$4 sm:$0xff]  }
  0x2e   :  { %v1274_v29 = vld [vmem:[#allocation2 + $0x74] ss:$8 sps:$4 sm:$0xff]   ;;  %v1276_v30 = vld [vmem:[#allocation2 + $0x70] ss:$8 sps:$4 sm:$0xff]   ;;  %v1249_v31 = vld [vmem:[%s1621_s0 + $0x20] sm:$0xff]   ;;  %v78_v3 = vsub.s32 0, %v1486_v2 }
  0x2f   :  { %544 = vmatpush1.bf16.msra.mxu1 %v1258_v15  ;;  %v1277_v32 = vld [vmem:[#allocation2 + $0x84] ss:$8 sps:$4 sm:$0xff]   ;;  %v1279_v33 = vld [vmem:[#allocation2 + $0x80] ss:$8 sps:$4 sm:$0xff]   ;;  %v1280_v34 = vld [vmem:[#allocation2 + $0x94] ss:$8 sps:$4 sm:$0xff]  }
  0x30   :  { %1032 = vmatmul.mubr.msk.bf16.vlgmr.msra.gmra.mrb[0].mxu0 %vm141_vm2, %v1245_v11  ;;  %545 = vmatprep.subr.bf16.mxu1 %v1259_v17  ;;  %v1282_v35 = vld [vmem:[#allocation2 + $0x90] ss:$8 sps:$4 sm:$0xff]   ;;  %v1250_v36 = vld [vmem:[%s1621_s0 + $0x28] sm:$0xff]   ;;  %v1286_v39 = vld [vmem:[#allocation2 + $0xb4] ss:$8 sps:$4 sm:$0xff]   ;;  %v82_v5 = vsub.s32 1, %v1486_v2 }
  0x31   :  { %218 = vmatprep.mubr.bf16.mxu0 %v1371_v0  ;;  %v1283_v37 = vld [vmem:[#allocation2 + $0xa4] ss:$8 sps:$4 sm:$0xff]   ;;  %v1285_v38 = vld [vmem:[#allocation2 + $0xa0] ss:$8 sps:$4 sm:$0xff]   ;;  %v1288_v40 = vld [vmem:[#allocation2 + $0xb0] ss:$8 sps:$4 sm:$0xff]  }
  0x32   :  { %v1251_v41 = vld [vmem:[%s1621_s0 + $0x30] sm:$0xff]   ;;  %v1289_v42 = vld [vmem:[#allocation2 + $0xc4] ss:$8 sps:$4 sm:$0xff]   ;;  %v1291_v43 = vld [vmem:[#allocation2 + $0xc0] ss:$8 sps:$4 sm:$0xff]  }
  0x33   :  { %546 = vmatpush1.bf16.msra.mxu1 %v1261_v18  ;;  %v1292_v44 = vld [vmem:[#allocation2 + $0xd4] ss:$8 sps:$4 sm:$0xff]   ;;  %v1294_v46 = vld [vmem:[#allocation2 + $0xd0] ss:$8 sps:$4 sm:$0xff]   ;;  %v1295_v47 = vld [vmem:[#allocation2 + $0xe4] ss:$8 sps:$4 sm:$0xff]  }
  0x34   :  { %547 = vmatprep.subr.bf16.mxu1 %v1262_v19  ;;  %v1252_v45 = vld [vmem:[%s1621_s0 + $0x38] sm:$0xff]   ;;  %v1297_v48 = vld [vmem:[#allocation2 + $0xe0] ss:$8 sps:$4 sm:$0xff]   ;;  %v1305_v55 = vld [vmem:[#allocation4 + $0x50] sm:$0xff]  }
  0x35   :  { %v1298_v49 = vld [vmem:[#allocation2 + $0xf4] ss:$8 sps:$4 sm:$0xff]   ;;  %v1300_v50 = vld [vmem:[#allocation2 + $0xf0] ss:$8 sps:$4 sm:$0xff]   ;;  %v1301_v51 = vld [vmem:[#allocation4 + $0x40] sm:$0xff]  }
  0x36   :  { %v1302_v52 = vld [vmem:[#allocation4] sm:$0xff]   ;;  %v1303_v53 = vld [vmem:[#allocation4 + $0x48] sm:$0xff]   ;;  %1168 = vmatprep.subr.bf16.mxu0 %v1301_v51  ;;  %v1306_v56 = vld [vmem:[#allocation4 + $0x10] sm:$0xff]  }
  0x37   :  { %548 = vmatpush1.bf16.msra.mxu1 %v1264_v20  ;;  %1169 = vmatpush3.bf16.msra.mxu0 %v1302_v52  ;;  %v1304_v54 = vld [vmem:[#allocation4 + $0x8] sm:$0xff]   ;;  %v1307_v57 = vld [vmem:[#allocation4 + $0x58] sm:$0xff]   ;;  %v1309_v59 = vld [vmem:[#allocation4 + $0x60] sm:$0xff]  }
  0x38   :  { %1033 = vmatmul.mubr.msk.bf16.gmra.mrb[4].mxu0 %vm141_vm2, %v1246_v16  ;;  %549 = vmatprep.subr.bf16.mxu1 %v1265_v22  ;;  %v1308_v58 = vld [vmem:[#allocation4 + $0x18] sm:$0xff]   ;;  %v1310_v60 = vld [vmem:[#allocation4 + $0x20] sm:$0xff]   ;;  %v1311_v61 = vld [vmem:[#allocation4 + $0x68] sm:$0xff]  }
  0x39   :  { %228 = vmatprep.mubr.bf16.mxu0 %v1371_v0  ;;  %1170 = vmatprep.subr.bf16.mxu0 %v1303_v53  ;;  %v1312_v62 = vld [vmem:[#allocation4 + $0x28] sm:$0xff]   ;;  %v1313_v63 = vld [vmem:[#allocation4 + $0x70] sm:$0xff]   ;;  %v74_v4 = vld [vmem:[%s1623_s2] sm:$0x3] }
  0x3a   :  { %v1495_v6 = vrot.slane %v74_v4, %v78_v3  ;;  %v1499_v7 = vrot.slane %v74_v4, %v82_v5 }
  0x3b   :  { %550 = vmatpush1.bf16.msra.mxu1 %v1267_v23  ;;  %1171 = vmatpush3.bf16.msra.mxu0 %v1304_v54 }
  0x3c   :  { %551 = vmatprep.subr.bf16.mxu1 %v1268_v24  ;;  %1172 = vmatprep.subr.bf16.mxu0 %v1305_v55 }
  0x3f   :  { %552 = vmatpush1.bf16.msra.mxu1 %v1270_v25  ;;  %1173 = vmatpush3.bf16.msra.mxu0 %v1306_v56 }
  0x40   :  { %1034 = vmatmul.mubr.msk.bf16.gmra.mrb[8].mxu0 %vm141_vm2, %v1247_v21  ;;  %553 = vmatprep.subr.bf16.mxu1 %v1271_v27 }
  0x41   :  { %238 = vmatprep.mubr.bf16.mxu0 %v1371_v0  ;;  %1174 = vmatprep.subr.bf16.mxu0 %v1307_v57 }
  0x43   :  { %554 = vmatpush1.bf16.msra.mxu1 %v1273_v28  ;;  %1175 = vmatpush3.bf16.msra.mxu0 %v1308_v58 }
  0x44   :  { %555 = vmatprep.subr.bf16.mxu1 %v1274_v29  ;;  %1176 = vmatprep.subr.bf16.mxu0 %v1309_v59 }
  0x47   :  { %556 = vmatpush1.bf16.msra.mxu1 %v1276_v30  ;;  %1177 = vmatpush3.bf16.msra.mxu0 %v1310_v60 }
  0x48   :  { %1035 = vmatmul.mubr.msk.bf16.gmra.mrb[12].mxu0 %vm141_vm2, %v1248_v26  ;;  %557 = vmatprep.subr.bf16.mxu1 %v1277_v32 }
  0x49   :  { %248 = vmatprep.mubr.bf16.mxu0 %v1371_v0  ;;  %1178 = vmatprep.subr.bf16.mxu0 %v1311_v61 }
  0x4b   :  { %558 = vmatpush1.bf16.msra.mxu1 %v1279_v33  ;;  %1179 = vmatpush3.bf16.msra.mxu0 %v1312_v62 }
  0x4c   :  { %559 = vmatprep.subr.bf16.mxu1 %v1280_v34  ;;  %1180 = vmatprep.subr.bf16.mxu0 %v1313_v63 }
  0x4f   :  { %560 = vmatpush1.bf16.msra.mxu1 %v1282_v35 }
  0x50   :  { %1036 = vmatmul.mubr.msk.bf16.gmra.mrb[16].mxu0 %vm141_vm2, %v1249_v31  ;;  %561 = vmatprep.subr.bf16.mxu1 %v1283_v37 }
  0x51   :  { %258 = vmatprep.mubr.bf16.mxu0 %v1371_v0 }
  0x53   :  { %562 = vmatpush1.bf16.msra.mxu1 %v1285_v38 }
  0x54   :  { %563 = vmatprep.subr.bf16.mxu1 %v1286_v39 }
  0x57   :  { %564 = vmatpush1.bf16.msra.mxu1 %v1288_v40 }
  0x58   :  { %1037 = vmatmul.mubr.msk.bf16.gmra.mrb[20].mxu0 %vm141_vm2, %v1250_v36  ;;  %565 = vmatprep.subr.bf16.mxu1 %v1289_v42 }
  0x59   :  { %268 = vmatprep.mubr.bf16.mxu0 %v1371_v0 }
  0x5b   :  { %566 = vmatpush1.bf16.msra.mxu1 %v1291_v43 }
  0x5c   :  { %567 = vmatprep.subr.bf16.mxu1 %v1292_v44 }
  0x5f   :  { %568 = vmatpush1.bf16.msra.mxu1 %v1294_v46 }
  0x60   :  { %1038 = vmatmul.mubr.msk.bf16.gmra.mrb[24].mxu0 %vm141_vm2, %v1251_v41  ;;  %569 = vmatprep.subr.bf16.mxu1 %v1295_v47 }
  0x61   :  { %278 = vmatprep.mubr.bf16.mxu0 %v1371_v0  ;;  %v1314_v0 = vld [vmem:[#allocation4 + $0x30] sm:$0xff]  }
  0x62   :  { %1181 = vmatpush3.bf16.msra.mxu0 %v1314_v0 }
  0x63   :  { %570 = vmatpush1.bf16.msra.mxu1 %v1297_v48 }
  0x64   :  { %571 = vmatprep.subr.bf16.mxu1 %v1298_v49 }
  0x67   :  { %572 = vmatpush1.bf16.msra.mxu1 %v1300_v50 }
  0x68   :  { %1039 = vmatmul.mubr.msk.bf16.gmra.mrb[28].mxu0 %vm141_vm2, %v1252_v45 }
 0x103   :  { %v210_v8 = vpop.f32.mrb[0].mxu0 }
 0x104   :  { %v211_v9 = vadd.f32 %v210_v8, %v1495_v6  ;;  %v212_v10 = vpop.f32.mrb[1].mxu0 }
 0x105   :  { %v213_v11 = vadd.f32 %v212_v10, %v1499_v7  ;;  %v214_v12 = vpop.f32.mrb[2].mxu0 }
 0x106   :  { %v215_v13 = vadd.f32 %v214_v12, %v1495_v6  ;;  %v216_v14 = vpop.f32.mrb[3].mxu0  ;;  %v289_v16 = vmax.f32 %v211_v9, 0.0 }
 0x107   :  { %v217_v15 = vadd.f32 %v216_v14, %v1499_v7  ;;  %v290_v18 = vmax.f32 %v213_v11, 0.0 }
 0x108   :  { %v291_v17 = vmax.f32 %v215_v13, 0.0 }
 0x109   :  { %v292_v19 = vmax.f32 %v217_v15, 0.0 }
 0x10a   :  { %v321_v20 = vpack.c.bf16 %v291_v17, %v289_v16 }
 0x10b   :  { %v220_v21 = vpop.f32.mrb[4].mxu0  ;;  %v322_v22 = vpack.c.bf16 %v292_v19, %v290_v18 }
 0x10c   :  { %v221_v23 = vadd.f32 %v220_v21, %v1495_v6  ;;  %v222_v24 = vpop.f32.mrb[5].mxu0 }
 0x10d   :  { %v223_v25 = vadd.f32 %v222_v24, %v1499_v7  ;;  %v224_v26 = vpop.f32.mrb[6].mxu0  ;;  %573 = vmatprep.mubr.bf16.mxu1 %v322_v22 }
 0x10e   :  { %v225_v27 = vadd.f32 %v224_v26, %v1495_v6  ;;  %v226_v28 = vpop.f32.mrb[7].mxu0  ;;  %574 = vmatmul.mubr.bf16.vlgmr.msra.gmra.mrb[0].mxu1 %v321_v20  ;;  %v293_v30 = vmax.f32 %v221_v23, 0.0 }
 0x10f   :  { %v227_v29 = vadd.f32 %v226_v28, %v1499_v7  ;;  %v294_v32 = vmax.f32 %v223_v25, 0.0 }
 0x110   :  { %v295_v31 = vmax.f32 %v225_v27, 0.0 }
 0x111   :  { %v296_v33 = vmax.f32 %v227_v29, 0.0 }
 0x112   :  { %v323_v34 = vpack.c.bf16 %v295_v31, %v293_v30 }
 0x113   :  { %v324_v35 = vpack.c.bf16 %v296_v33, %v294_v32  ;;  %v230_v36 = vpop.f32.mrb[8].mxu0 }
 0x114   :  { %v231_v37 = vadd.f32 %v230_v36, %v1495_v6  ;;  %v232_v38 = vpop.f32.mrb[9].mxu0 }
 0x115   :  { %v233_v39 = vadd.f32 %v232_v38, %v1499_v7  ;;  %v234_v40 = vpop.f32.mrb[10].mxu0  ;;  %583 = vmatprep.mubr.bf16.mxu1 %v324_v35 }
 0x116   :  { %v235_v41 = vadd.f32 %v234_v40, %v1495_v6  ;;  %v236_v42 = vpop.f32.mrb[11].mxu0  ;;  %584 = vmatmul.mubr.bf16.gmra.mrb[4].mxu1 %v323_v34  ;;  %v297_v44 = vmax.f32 %v231_v37, 0.0 }
 0x117   :  { %v237_v43 = vadd.f32 %v236_v42, %v1499_v7  ;;  %v298_v46 = vmax.f32 %v233_v39, 0.0 }
 0x118   :  { %v299_v45 = vmax.f32 %v235_v41, 0.0 }
 0x119   :  { %v300_v47 = vmax.f32 %v237_v43, 0.0 }
 0x11a   :  { %v325_v48 = vpack.c.bf16 %v299_v45, %v297_v44 }
 0x11b   :  { %v326_v49 = vpack.c.bf16 %v300_v47, %v298_v46  ;;  %v240_v50 = vpop.f32.mrb[12].mxu0 }
 0x11c   :  { %v241_v51 = vadd.f32 %v240_v50, %v1495_v6  ;;  %v242_v52 = vpop.f32.mrb[13].mxu0 }
 0x11d   :  { %v243_v53 = vadd.f32 %v242_v52, %v1499_v7  ;;  %v244_v54 = vpop.f32.mrb[14].mxu0  ;;  %593 = vmatprep.mubr.bf16.mxu1 %v326_v49 }
 0x11e   :  { %v245_v55 = vadd.f32 %v244_v54, %v1495_v6  ;;  %v246_v56 = vpop.f32.mrb[15].mxu0  ;;  %594 = vmatmul.mubr.bf16.gmra.mrb[8].mxu1 %v325_v48  ;;  %v301_v58 = vmax.f32 %v241_v51, 0.0 }
 0x11f   :  { %v247_v57 = vadd.f32 %v246_v56, %v1499_v7  ;;  %v302_v60 = vmax.f32 %v243_v53, 0.0 }
 0x120   :  { %v303_v59 = vmax.f32 %v245_v55, 0.0 }
 0x121   :  { %v304_v61 = vmax.f32 %v247_v57, 0.0 }
 0x122   :  { %v327_v62 = vpack.c.bf16 %v303_v59, %v301_v58 }
 0x123   :  { %v328_v63 = vpack.c.bf16 %v304_v61, %v302_v60  ;;  %v250_v0 = vpop.f32.mrb[16].mxu0  ;;  %v1315_v61 = vld [vmem:[#allocation4 + $0x78] sm:$0xff]  }
 0x124   :  { %v251_v1 = vadd.f32 %v250_v0, %v1495_v6  ;;  %v252_v4 = vpop.f32.mrb[17].mxu0  ;;  %1182 = vmatprep.subr.bf16.mxu0 %v1315_v61 }
 0x125   :  { %v253_v8 = vadd.f32 %v252_v4, %v1499_v7  ;;  %v254_v9 = vpop.f32.mrb[18].mxu0  ;;  %603 = vmatprep.mubr.bf16.mxu1 %v328_v63 }
 0x126   :  { %v255_v10 = vadd.f32 %v254_v9, %v1495_v6  ;;  %v256_v11 = vpop.f32.mrb[19].mxu0  ;;  %604 = vmatmul.mubr.bf16.gmra.mrb[12].mxu1 %v327_v62  ;;  %v305_v13 = vmax.f32 %v251_v1, 0.0  ;;  %v1316_v62 = vld [vmem:[#allocation4 + $0x38] sm:$0xff]  }
 0x127   :  { %v257_v12 = vadd.f32 %v256_v11, %v1499_v7  ;;  %v306_v15 = vmax.f32 %v253_v8, 0.0  ;;  %1183 = vmatpush3.bf16.msra.mxu0 %v1316_v62 }
 0x128   :  { %v307_v14 = vmax.f32 %v255_v10, 0.0 }
 0x129   :  { %v308_v16 = vmax.f32 %v257_v12, 0.0 }
 0x12a   :  { %v329_v17 = vpack.c.bf16 %v307_v14, %v305_v13 }
 0x12b   :  { %v330_v18 = vpack.c.bf16 %v308_v16, %v306_v15  ;;  %v260_v19 = vpop.f32.mrb[20].mxu0 }
 0x12c   :  { %v261_v20 = vadd.f32 %v260_v19, %v1495_v6  ;;  %v262_v21 = vpop.f32.mrb[21].mxu0 }
 0x12d   :  { %v263_v22 = vadd.f32 %v262_v21, %v1499_v7  ;;  %v264_v23 = vpop.f32.mrb[22].mxu0  ;;  %613 = vmatprep.mubr.bf16.mxu1 %v330_v18 }
 0x12e   :  { %v265_v24 = vadd.f32 %v264_v23, %v1495_v6  ;;  %v266_v25 = vpop.f32.mrb[23].mxu0  ;;  %614 = vmatmul.mubr.bf16.gmra.mrb[16].mxu1 %v329_v17  ;;  %v309_v27 = vmax.f32 %v261_v20, 0.0 }
 0x12f   :  { %v267_v26 = vadd.f32 %v266_v25, %v1499_v7  ;;  %v310_v29 = vmax.f32 %v263_v22, 0.0 }
 0x130   :  { %v311_v28 = vmax.f32 %v265_v24, 0.0 }
 0x131   :  { %v312_v30 = vmax.f32 %v267_v26, 0.0 }
 0x132   :  { %v331_v31 = vpack.c.bf16 %v311_v28, %v309_v27 }
 0x133   :  { %v332_v32 = vpack.c.bf16 %v312_v30, %v310_v29  ;;  %v270_v33 = vpop.f32.mrb[24].mxu0 }
 0x134   :  { %v271_v34 = vadd.f32 %v270_v33, %v1495_v6  ;;  %v272_v35 = vpop.f32.mrb[25].mxu0 }
 0x135   :  { %v273_v36 = vadd.f32 %v272_v35, %v1499_v7  ;;  %v274_v37 = vpop.f32.mrb[26].mxu0  ;;  %623 = vmatprep.mubr.bf16.mxu1 %v332_v32 }
 0x136   :  { %v275_v38 = vadd.f32 %v274_v37, %v1495_v6  ;;  %v276_v39 = vpop.f32.mrb[27].mxu0  ;;  %624 = vmatmul.mubr.bf16.gmra.mrb[20].mxu1 %v331_v31  ;;  %v313_v41 = vmax.f32 %v271_v34, 0.0 }
 0x137   :  { %v277_v40 = vadd.f32 %v276_v39, %v1499_v7  ;;  %v314_v43 = vmax.f32 %v273_v36, 0.0 }
 0x138   :  { %v315_v42 = vmax.f32 %v275_v38, 0.0 }
 0x139   :  { %v316_v44 = vmax.f32 %v277_v40, 0.0 }
 0x13a   :  { %v333_v45 = vpack.c.bf16 %v315_v42, %v313_v41 }
 0x13b   :  { %v334_v46 = vpack.c.bf16 %v316_v44, %v314_v43  ;;  %v280_v47 = vpop.f32.mrb[28].mxu0 }
 0x13c   :  { %v281_v48 = vadd.f32 %v280_v47, %v1495_v6  ;;  %v282_v49 = vpop.f32.mrb[29].mxu0 }
 0x13d   :  { %v283_v50 = vadd.f32 %v282_v49, %v1499_v7  ;;  %v284_v51 = vpop.f32.mrb[30].mxu0  ;;  %633 = vmatprep.mubr.bf16.mxu1 %v334_v46 }
 0x13e   :  { %v285_v52 = vadd.f32 %v284_v51, %v1495_v6  ;;  %v286_v53 = vpop.f32.mrb[31].mxu0  ;;  %634 = vmatmul.mubr.bf16.gmra.mrb[24].mxu1 %v333_v45  ;;  %v317_v55 = vmax.f32 %v281_v48, 0.0  ;;  %v369_v6 = vld [vmem:[%s1625_s4] sm:$0x3] }
 0x13f   :  { %v287_v54 = vadd.f32 %v286_v53, %v1499_v7  ;;  %v318_v57 = vmax.f32 %v283_v50, 0.0  ;;  %v1538_v63 = vrot.slane %v369_v6, %v78_v3  ;;  %v1542_v7 = vrot.slane %v369_v6, %v82_v5 }
 0x140   :  { %v319_v56 = vmax.f32 %v285_v52, 0.0 }
 0x141   :  { %v320_v58 = vmax.f32 %v287_v54, 0.0 }
 0x142   :  { %v335_v59 = vpack.c.bf16 %v319_v56, %v317_v55 }
 0x143   :  { %v336_v60 = vpack.c.bf16 %v320_v58, %v318_v57 }
 0x145   :  { %643 = vmatprep.mubr.bf16.mxu1 %v336_v60 }
 0x146   :  { %644 = vmatmul.mubr.bf16.gmra.mrb[28].mxu1 %v335_v59 }
 0x1e1   :  { %v575_v0 = vpop.f32.mrb[0].mxu1 }
 0x1e2   :  { %v576_v1 = vadd.f32 %v575_v0, %v1538_v63  ;;  %v577_v4 = vpop.f32.mrb[1].mxu1 }
 0x1e3   :  { %v578_v8 = vadd.f32 %v577_v4, %v1542_v7  ;;  %v579_v9 = vpop.f32.mrb[2].mxu1 }
 0x1e4   :  { %v580_v10 = vadd.f32 %v579_v9, %v1538_v63  ;;  %v581_v11 = vpop.f32.mrb[3].mxu1  ;;  %v654_v13 = vmax.f32 %v576_v1, 0.0 }
 0x1e5   :  { %v582_v12 = vadd.f32 %v581_v11, %v1542_v7  ;;  %v655_v3 = vmax.f32 %v578_v8, 0.0 }
 0x1e6   :  { %v656_v14 = vmax.f32 %v580_v10, 0.0 }
 0x1e7   :  { %v657_v15 = vmax.f32 %v582_v12, 0.0 }
 0x1e8   :  { %v686_v16 = vpack.c.bf16 %v656_v14, %v654_v13 }
 0x1e9   :  { %v687_v2 = vpack.c.bf16 %v657_v15, %v655_v3  ;;  %v585_v5 = vpop.f32.mrb[4].mxu1 }
 0x1ea   :  { %v586_v17 = vadd.f32 %v585_v5, %v1538_v63  ;;  %v587_v18 = vpop.f32.mrb[5].mxu1 }
 0x1eb   :  { %v588_v19 = vadd.f32 %v587_v18, %v1542_v7  ;;  %v589_v20 = vpop.f32.mrb[6].mxu1  ;;  %869 = vmatprep.mubr.bf16.mxu0 %v687_v2 }
 0x1ec   :  { %v590_v21 = vadd.f32 %v589_v20, %v1538_v63  ;;  %v591_v22 = vpop.f32.mrb[7].mxu1  ;;  %870 = vmatmul.mubr.bf16.vlgmr.msra.gmra.mrb[32].mxu0 %v686_v16  ;;  %v658_v24 = vmax.f32 %v586_v17, 0.0 }
 0x1ed   :  { %v592_v23 = vadd.f32 %v591_v22, %v1542_v7  ;;  %v659_v26 = vmax.f32 %v588_v19, 0.0 }
 0x1ee   :  { %v660_v25 = vmax.f32 %v590_v21, 0.0 }
 0x1ef   :  { %v661_v27 = vmax.f32 %v592_v23, 0.0 }
 0x1f0   :  { %v688_v28 = vpack.c.bf16 %v660_v25, %v658_v24 }
 0x1f1   :  { %v689_v29 = vpack.c.bf16 %v661_v27, %v659_v26  ;;  %v595_v30 = vpop.f32.mrb[8].mxu1 }
 0x1f2   :  { %v596_v31 = vadd.f32 %v595_v30, %v1538_v63  ;;  %v597_v32 = vpop.f32.mrb[9].mxu1 }
 0x1f3   :  { %v598_v33 = vadd.f32 %v597_v32, %v1542_v7  ;;  %v599_v34 = vpop.f32.mrb[10].mxu1  ;;  %877 = vmatprep.mubr.bf16.mxu0 %v689_v29 }
 0x1f4   :  { %v600_v35 = vadd.f32 %v599_v34, %v1538_v63  ;;  %v601_v36 = vpop.f32.mrb[11].mxu1  ;;  %878 = vmatmul.mubr.bf16.gmra.mrb[36].mxu0 %v688_v28  ;;  %v662_v38 = vmax.f32 %v596_v31, 0.0 }
 0x1f5   :  { %v602_v37 = vadd.f32 %v601_v36, %v1542_v7  ;;  %v663_v40 = vmax.f32 %v598_v33, 0.0 }
 0x1f6   :  { %v664_v39 = vmax.f32 %v600_v35, 0.0 }
 0x1f7   :  { %v665_v41 = vmax.f32 %v602_v37, 0.0 }
 0x1f8   :  { %v690_v42 = vpack.c.bf16 %v664_v39, %v662_v38 }
 0x1f9   :  { %v691_v43 = vpack.c.bf16 %v665_v41, %v663_v40  ;;  %v605_v44 = vpop.f32.mrb[12].mxu1 }
 0x1fa   :  { %v606_v45 = vadd.f32 %v605_v44, %v1538_v63  ;;  %v607_v46 = vpop.f32.mrb[13].mxu1 }
 0x1fb   :  { %v608_v47 = vadd.f32 %v607_v46, %v1542_v7  ;;  %v609_v48 = vpop.f32.mrb[14].mxu1  ;;  %885 = vmatprep.mubr.bf16.mxu0 %v691_v43 }
 0x1fc   :  { %v610_v49 = vadd.f32 %v609_v48, %v1538_v63  ;;  %v611_v50 = vpop.f32.mrb[15].mxu1  ;;  %886 = vmatmul.mubr.bf16.gmra.mrb[40].mxu0 %v690_v42  ;;  %v666_v52 = vmax.f32 %v606_v45, 0.0 }
 0x1fd   :  { %v612_v51 = vadd.f32 %v611_v50, %v1542_v7  ;;  %v667_v54 = vmax.f32 %v608_v47, 0.0 }
 0x1fe   :  { %v668_v53 = vmax.f32 %v610_v49, 0.0 }
 0x1ff   :  { %v669_v55 = vmax.f32 %v612_v51, 0.0 }
 0x200   :  { %v692_v56 = vpack.c.bf16 %v668_v53, %v666_v52 }
 0x201   :  { %v693_v57 = vpack.c.bf16 %v669_v55, %v667_v54  ;;  %v615_v58 = vpop.f32.mrb[16].mxu1 }
 0x202   :  { %v616_v59 = vadd.f32 %v615_v58, %v1538_v63  ;;  %v617_v60 = vpop.f32.mrb[17].mxu1 }
 0x203   :  { %v618_v61 = vadd.f32 %v617_v60, %v1542_v7  ;;  %v619_v62 = vpop.f32.mrb[18].mxu1  ;;  %893 = vmatprep.mubr.bf16.mxu0 %v693_v57 }
 0x204   :  { %v620_v6 = vadd.f32 %v619_v62, %v1538_v63  ;;  %v621_v0 = vpop.f32.mrb[19].mxu1  ;;  %894 = vmatmul.mubr.bf16.gmra.mrb[44].mxu0 %v692_v56  ;;  %v670_v4 = vmax.f32 %v616_v59, 0.0 }
 0x205   :  { %v622_v1 = vadd.f32 %v621_v0, %v1542_v7  ;;  %v671_v9 = vmax.f32 %v618_v61, 0.0 }
 0x206   :  { %v672_v8 = vmax.f32 %v620_v6, 0.0 }
 0x207   :  { %v673_v10 = vmax.f32 %v622_v1, 0.0 }
 0x208   :  { %v694_v11 = vpack.c.bf16 %v672_v8, %v670_v4 }
 0x209   :  { %v695_v12 = vpack.c.bf16 %v673_v10, %v671_v9  ;;  %v625_v13 = vpop.f32.mrb[20].mxu1 }
 0x20a   :  { %v626_v14 = vadd.f32 %v625_v13, %v1538_v63  ;;  %v627_v3 = vpop.f32.mrb[21].mxu1 }
 0x20b   :  { %v628_v15 = vadd.f32 %v627_v3, %v1542_v7  ;;  %v629_v16 = vpop.f32.mrb[22].mxu1  ;;  %901 = vmatprep.mubr.bf16.mxu0 %v695_v12 }
 0x20c   :  { %v630_v2 = vadd.f32 %v629_v16, %v1538_v63  ;;  %v631_v5 = vpop.f32.mrb[23].mxu1  ;;  %902 = vmatmul.mubr.bf16.gmra.mrb[48].mxu0 %v694_v11  ;;  %v674_v18 = vmax.f32 %v626_v14, 0.0 }
 0x20d   :  { %v632_v17 = vadd.f32 %v631_v5, %v1542_v7  ;;  %v675_v20 = vmax.f32 %v628_v15, 0.0 }
 0x20e   :  { %v676_v19 = vmax.f32 %v630_v2, 0.0 }
 0x20f   :  { %v677_v21 = vmax.f32 %v632_v17, 0.0 }
 0x210   :  { %v696_v22 = vpack.c.bf16 %v676_v19, %v674_v18 }
 0x211   :  { %v697_v23 = vpack.c.bf16 %v677_v21, %v675_v20  ;;  %v635_v24 = vpop.f32.mrb[24].mxu1 }
 0x212   :  { %v636_v25 = vadd.f32 %v635_v24, %v1538_v63  ;;  %v637_v26 = vpop.f32.mrb[25].mxu1 }
 0x213   :  { %v638_v27 = vadd.f32 %v637_v26, %v1542_v7  ;;  %v639_v28 = vpop.f32.mrb[26].mxu1  ;;  %909 = vmatprep.mubr.bf16.mxu0 %v697_v23 }
 0x214   :  { %v640_v29 = vadd.f32 %v639_v28, %v1538_v63  ;;  %v641_v30 = vpop.f32.mrb[27].mxu1  ;;  %910 = vmatmul.mubr.bf16.gmra.mrb[52].mxu0 %v696_v22  ;;  %v678_v32 = vmax.f32 %v636_v25, 0.0 }
 0x215   :  { %v642_v31 = vadd.f32 %v641_v30, %v1542_v7  ;;  %v679_v34 = vmax.f32 %v638_v27, 0.0 }
 0x216   :  { %v680_v33 = vmax.f32 %v640_v29, 0.0 }
 0x217   :  { %v681_v35 = vmax.f32 %v642_v31, 0.0 }
 0x218   :  { %v698_v36 = vpack.c.bf16 %v680_v33, %v678_v32 }
 0x219   :  { %v699_v37 = vpack.c.bf16 %v681_v35, %v679_v34  ;;  %v645_v38 = vpop.f32.mrb[28].mxu1 }
 0x21a   :  { %v646_v39 = vadd.f32 %v645_v38, %v1538_v63  ;;  %v647_v40 = vpop.f32.mrb[29].mxu1 }
 0x21b   :  { %v648_v41 = vadd.f32 %v647_v40, %v1542_v7  ;;  %v649_v42 = vpop.f32.mrb[30].mxu1  ;;  %917 = vmatprep.mubr.bf16.mxu0 %v699_v37 }
 0x21c   :  { %v650_v43 = vadd.f32 %v649_v42, %v1538_v63  ;;  %v651_v44 = vpop.f32.mrb[31].mxu1  ;;  %918 = vmatmul.mubr.bf16.gmra.mrb[56].mxu0 %v698_v36  ;;  %v682_v46 = vmax.f32 %v646_v39, 0.0  ;;  %v1579_v63 = vld [vmem:[%s1627_s6] ss:$0 sm:$0xff] }
 0x21d   :  { %v652_v45 = vadd.f32 %v651_v44, %v1542_v7  ;;  %v683_v48 = vmax.f32 %v648_v41, 0.0 }
 0x21e   :  { %v684_v47 = vmax.f32 %v650_v43, 0.0 }
 0x21f   :  { %v685_v49 = vmax.f32 %v652_v45, 0.0 }
 0x220   :  { %v700_v50 = vpack.c.bf16 %v684_v47, %v682_v46 }
 0x221   :  { %v701_v51 = vpack.c.bf16 %v685_v49, %v683_v48 }
 0x223   :  { %925 = vmatprep.mubr.bf16.mxu0 %v701_v51 }
 0x224   :  { %926 = vmatmul.mubr.bf16.gmra.mrb[60].mxu0 %v700_v50 }
 0x2bf   :  { %v1184_v52 = vpop.f32.mrb[32].mxu0 }
 0x2c0   :  { %v1185_v53 = vpop.f32.mrb[33].mxu0 }
 0x2c1   :  { %v1186_v54 = vadd.f32 %v1185_v53, %v1184_v52  ;;  %v1187_v55 = vpop.f32.mrb[34].mxu0 }
 0x2c2   :  { %v1188_v56 = vpop.f32.mrb[35].mxu0 }
 0x2c3   :  { %v1189_v57 = vadd.f32 %v1188_v56, %v1187_v55  ;;  %v872_v7 = vadd.f32 %v1186_v54, %v1579_v63 }
 0x2c5   :  { %v875_v58 = vadd.f32 %v1189_v57, %v1579_v63 }
 0x2c7   :  { %v1124_v59 = vpack.c.bf16 %v875_v58, %v872_v7  ;;  %v1190_v60 = vpop.f32.mrb[36].mxu0 }
 0x2c8   :  { %v1191_v61 = vpop.f32.mrb[37].mxu0 }
 0x2c9   :  { %1125 = vst [vmem:[%s1628_s7] sm:$0xff] %v1124_v59   ;;  %v1192_v62 = vadd.f32 %v1191_v61, %v1190_v60  ;;  %v1193_v6 = vpop.f32.mrb[38].mxu0 }
 0x2ca   :  { %v1194_v0 = vpop.f32.mrb[39].mxu0 }
 0x2cb   :  { %v1195_v1 = vadd.f32 %v1194_v0, %v1193_v6  ;;  %v880_v4 = vadd.f32 %v1192_v62, %v1579_v63 }
 0x2cd   :  { %v883_v8 = vadd.f32 %v1195_v1, %v1579_v63 }
 0x2cf   :  { %v1129_v9 = vpack.c.bf16 %v883_v8, %v880_v4  ;;  %v1196_v10 = vpop.f32.mrb[40].mxu0 }
 0x2d0   :  { %v1197_v11 = vpop.f32.mrb[41].mxu0 }
 0x2d1   :  { %1161 = vst [vmem:[%s1628_s7 + $0x8] sm:$0xff] %v1129_v9   ;;  %v1198_v12 = vadd.f32 %v1197_v11, %v1196_v10  ;;  %v1199_v13 = vpop.f32.mrb[42].mxu0 }
 0x2d2   :  { %v1200_v14 = vpop.f32.mrb[43].mxu0 }
 0x2d3   :  { %v1201_v3 = vadd.f32 %v1200_v14, %v1199_v13  ;;  %v888_v15 = vadd.f32 %v1198_v12, %v1579_v63 }
 0x2d5   :  { %v891_v16 = vadd.f32 %v1201_v3, %v1579_v63 }
 0x2d7   :  { %v1134_v2 = vpack.c.bf16 %v891_v16, %v888_v15  ;;  %v1202_v5 = vpop.f32.mrb[44].mxu0 }
 0x2d8   :  { %v1203_v17 = vpop.f32.mrb[45].mxu0 }
 0x2d9   :  { %1162 = vst [vmem:[%s1628_s7 + $0x10] sm:$0xff] %v1134_v2   ;;  %v1204_v18 = vadd.f32 %v1203_v17, %v1202_v5  ;;  %v1205_v19 = vpop.f32.mrb[46].mxu0 }
 0x2da   :  { %v1206_v20 = vpop.f32.mrb[47].mxu0 }
 0x2db   :  { %v1207_v21 = vadd.f32 %v1206_v20, %v1205_v19  ;;  %v896_v22 = vadd.f32 %v1204_v18, %v1579_v63 }
 0x2dd   :  { %v899_v23 = vadd.f32 %v1207_v21, %v1579_v63 }
 0x2df   :  { %v1139_v24 = vpack.c.bf16 %v899_v23, %v896_v22  ;;  %v1208_v25 = vpop.f32.mrb[48].mxu0 }
 0x2e0   :  { %v1209_v26 = vpop.f32.mrb[49].mxu0 }
 0x2e1   :  { %1163 = vst [vmem:[%s1628_s7 + $0x18] sm:$0xff] %v1139_v24   ;;  %v1210_v27 = vadd.f32 %v1209_v26, %v1208_v25  ;;  %v1211_v28 = vpop.f32.mrb[50].mxu0 }
 0x2e2   :  { %v1212_v29 = vpop.f32.mrb[51].mxu0 }
 0x2e3   :  { %v1213_v30 = vadd.f32 %v1212_v29, %v1211_v28  ;;  %v904_v31 = vadd.f32 %v1210_v27, %v1579_v63 }
 0x2e5   :  { %v907_v32 = vadd.f32 %v1213_v30, %v1579_v63 }
 0x2e7   :  { %v1144_v33 = vpack.c.bf16 %v907_v32, %v904_v31  ;;  %v1214_v34 = vpop.f32.mrb[52].mxu0 }
 0x2e8   :  { %v1215_v35 = vpop.f32.mrb[53].mxu0 }
 0x2e9   :  { %1164 = vst [vmem:[%s1628_s7 + $0x20] sm:$0xff] %v1144_v33   ;;  %v1216_v36 = vadd.f32 %v1215_v35, %v1214_v34  ;;  %v1217_v37 = vpop.f32.mrb[54].mxu0 }
 0x2ea   :  { %v1218_v38 = vpop.f32.mrb[55].mxu0 }
 0x2eb   :  { %v1219_v39 = vadd.f32 %v1218_v38, %v1217_v37  ;;  %v912_v40 = vadd.f32 %v1216_v36, %v1579_v63 }
 0x2ed   :  { %v915_v41 = vadd.f32 %v1219_v39, %v1579_v63 }
 0x2ef   :  { %v1149_v42 = vpack.c.bf16 %v915_v41, %v912_v40  ;;  %v1220_v43 = vpop.f32.mrb[56].mxu0 }
 0x2f0   :  { %v1221_v44 = vpop.f32.mrb[57].mxu0 }
 0x2f1   :  { %1165 = vst [vmem:[%s1628_s7 + $0x28] sm:$0xff] %v1149_v42   ;;  %v1222_v45 = vadd.f32 %v1221_v44, %v1220_v43  ;;  %v1223_v46 = vpop.f32.mrb[58].mxu0 }
 0x2f2   :  { %v1224_v47 = vpop.f32.mrb[59].mxu0 }
 0x2f3   :  { %v1225_v48 = vadd.f32 %v1224_v47, %v1223_v46  ;;  %v920_v49 = vadd.f32 %v1222_v45, %v1579_v63 }
 0x2f5   :  { %v923_v50 = vadd.f32 %v1225_v48, %v1579_v63 }
 0x2f7   :  { %v1154_v51 = vpack.c.bf16 %v923_v50, %v920_v49  ;;  %v1226_v52 = vpop.f32.mrb[60].mxu0 }
 0x2f8   :  { %v1227_v53 = vpop.f32.mrb[61].mxu0 }
 0x2f9   :  { %1166 = vst [vmem:[%s1628_s7 + $0x30] sm:$0xff] %v1154_v51   ;;  %v1228_v54 = vadd.f32 %v1227_v53, %v1226_v52  ;;  %v1229_v55 = vpop.f32.mrb[62].mxu0 }
 0x2fa   :  { %v1230_v56 = vpop.f32.mrb[63].mxu0 }
 0x2fb   :  { %v1231_v57 = vadd.f32 %v1230_v56, %v1229_v55  ;;  %v928_v7 = vadd.f32 %v1228_v54, %v1579_v63 }
 0x2fd   :  { %v931_v58 = vadd.f32 %v1231_v57, %v1579_v63 }
 0x2ff   :  { %v1159_v59 = vpack.c.bf16 %v931_v58, %v928_v7 }
 0x301   :  { %1167 = vst [vmem:[%s1628_s7 + $0x38] sm:$0xff] %v1159_v59  }
 0x302   :  { %1018 = vsyncpa [#allocation3], 1 }
 0x303   :  { %1019 = vsyncpa [#allocation5], 1 }

</bundles_post_ra>
